<compile_context>
chip_gen: v7x
topology: tpu7x:2x2x1
jax: 0.10.0
libtpu: 0.0.40
codegen_flags: <defaults>
</compile_context>

<pallas_src>
import jax
import jax.numpy as jnp
from jax.experimental import pallas as pl
from jax.experimental.pallas import tpu as pltpu


_OUT_ROWS = 8           # sublane-dense transposed output: row 0 = q1, row 1 = q2
_MAX_BATCH_TILE = 2048  # rows per grid step (tiny footprint at these widths)
_MIN_SPLIT_BATCH = 256  # below this, a single full-array block (no padding)


def _cdiv(a, b):
    return -(-a // b)


def _round_up(a, b):
    return _cdiv(a, b) * b


def _qnet_kernel(s_ref, a_ref,
                 w1s_ref, w1a_ref, b1_ref,
                 w2_ref, b2_ref,
                 w3t_ref, b3t_ref,
                 qt_ref):
    """Fused twin-Q forward: 3 MXU contractions, ReLU on the first two layers."""
    # Layer 1 (concat folded into split weights): [TB, 2H]
    h = (jnp.dot(s_ref[...], w1s_ref[...], preferred_element_type=jnp.float32)
         + jnp.dot(a_ref[...], w1a_ref[...], preferred_element_type=jnp.float32)
         + b1_ref[...])
    h = jnp.maximum(h, 0.0)
    # Layer 2 (block-diagonal weight keeps the two heads independent): [TB, 2H]
    h = jnp.dot(h, w2_ref[...], preferred_element_type=jnp.float32) + b2_ref[...]
    h = jnp.maximum(h, 0.0)
    # Layer 3, computed transposed:  q_t[o, b] = sum_k w3t[o, k] * h[b, k]
    # (same contraction pattern as q @ k^T in flash attention).  Result is a
    # compact, lane-dense [8, TB] tile; rows 0/1 hold q1/q2, rest is junk.
    q_t = jax.lax.dot_general(
        w3t_ref[...], h,
        dimension_numbers=(((1,), (1,)), ((), ())),
        preferred_element_type=jnp.float32)
    qt_ref[...] = (q_t + b3t_ref[...]).astype(qt_ref.dtype)


def pack_qnetwork_params(params, num_inputs):
    """Pack the 6 PyTorch-style linear layers into the fused kernel layout.

    Weights are stored transposed as [in_features, out_features]; biases may be
    shaped [out] or [1, out] (real PyTorch checkpoints store (out,)).
    """
    (w1, b1, w2, b2, w3, b3, w4, b4, w5, b5, w6, b6) = params
    row = lambda b: jnp.asarray(b, jnp.float32).reshape(1, -1)
    hidden = w1.shape[1]

    # Layer 1: split rows (state / action) and concat the two heads on columns.
    w1s = jnp.concatenate([w1[:num_inputs], w4[:num_inputs]], axis=1)   # [ni, 2H]
    w1a = jnp.concatenate([w1[num_inputs:], w4[num_inputs:]], axis=1)   # [na, 2H]
    b1f = jnp.concatenate([row(b1), row(b4)], axis=1)                   # [1, 2H]

    # Layer 2: block-diagonal so head-1 / head-2 activations never mix.
    # Fine while hidden is small (2H <= 128 => one MXU pass either way);
    # split back into two [H, H] dots if hidden grows to >= 128.
    z = jnp.zeros((hidden, hidden), jnp.float32)
    w2f = jnp.block([[w2, z], [z, w5]])                                 # [2H, 2H]
    b2f = jnp.concatenate([row(b2), row(b5)], axis=1)                   # [1, 2H]

    # Layer 3, transposed + sublane-padded: [8, 2H]; row 0 -> q1, row 1 -> q2.
    w3t = jnp.zeros((_OUT_ROWS, 2 * hidden), jnp.float32)
    w3t = w3t.at[0, :hidden].set(w3[:, 0]).at[1, hidden:].set(w6[:, 0])
    b3t = jnp.zeros((_OUT_ROWS, 1), jnp.float32)
    b3t = b3t.at[0, 0].set(row(b3)[0, 0]).at[1, 0].set(row(b6)[0, 0])

    return (w1s, w1a, b1f, w2f, b2f, w3t, b3t)


@jax.jit
def qnetwork_forward(state, action, packed_params):
    """Pallas implementation of QNetwork.forward(state, action) -> (q1, q2)."""
    batch, num_inputs = state.shape
    num_actions = action.shape[1]
    (w1s, w1a, b1f, w2f, b2f, w3t, b3t) = packed_params

    if batch < _MIN_SPLIT_BATCH:
        # Single full-array block: no divisibility constraints, no padding.
        n_steps, tb, b_pad = 1, batch, batch
    else:
        # >= 2 (even) grid steps so v7x's two TensorCores both get work;
        # batch tile is a multiple of 128 so the transposed output block
        # (8, tb) stays lane-dense, and b_pad is a multiple of tb.
        n_steps = max(2, _cdiv(batch, _MAX_BATCH_TILE))
        n_steps += n_steps & 1
        tb = _round_up(_cdiv(batch, n_steps), 128)
        b_pad = tb * n_steps

    s = state if b_pad == batch else jnp.pad(state, ((0, b_pad - batch), (0, 0)))
    a = action if b_pad == batch else jnp.pad(action, ((0, b_pad - batch), (0, 0)))

    def row_spec(cols):
        return pl.BlockSpec((tb, cols), lambda i: (i, 0))

    def weight_spec(shape):
        # Constant block index: weights stay resident across grid steps.
        return pl.BlockSpec(shape, lambda i: (0, 0))

    qt = pl.pallas_call(
        _qnet_kernel,
        out_shape=jax.ShapeDtypeStruct((_OUT_ROWS, b_pad), jnp.float32),
        grid=(n_steps,),
        in_specs=[
            row_spec(num_inputs),
            row_spec(num_actions),
            weight_spec(w1s.shape),
            weight_spec(w1a.shape),
            weight_spec(b1f.shape),
            weight_spec(w2f.shape),
            weight_spec(b2f.shape),
            weight_spec(w3t.shape),
            weight_spec(b3t.shape),
        ],
        # Compact transposed output: block (8, tb) along the lane (batch) axis.
        out_specs=pl.BlockSpec((_OUT_ROWS, tb), lambda i: (0, i)),
        compiler_params=pltpu.CompilerParams(
            dimension_semantics=("parallel",)),
    )(s, a, w1s, w1a, b1f, w2f, b2f, w3t, b3t)

    # Single compact slice of the two useful rows, then split (cheap reshapes).
    q12 = qt[:2, :batch]
    q1 = q12[0][:, None]
    q2 = q12[1][:, None]
    return q1, q2


def _xavier_uniform(key, fan_in, fan_out, gain=1.0):
    # torch.nn.init.xavier_uniform_ with gain=1 on a [out, in] weight;
    # we directly build the transposed [in, out] layout used by the kernel.
    limit = gain * jnp.sqrt(6.0 / (fan_in + fan_out))
    return jax.random.uniform(
        key, (fan_in, fan_out), dtype=jnp.float32, minval=-limit, maxval=limit
    )


def init_qnetwork_params(key, num_inputs, num_actions, hidden_size):
    d_in = num_inputs + num_actions
    keys = jax.random.split(key, 6)
    # Linear{1..6}: weights xavier_uniform (gain=1), biases zero (constant_ 0).
    w1 = _xavier_uniform(keys[0], d_in, hidden_size)
    w2 = _xavier_uniform(keys[1], hidden_size, hidden_size)
    w3 = _xavier_uniform(keys[2], hidden_size, 1)
    w4 = _xavier_uniform(keys[3], d_in, hidden_size)
    w5 = _xavier_uniform(keys[4], hidden_size, hidden_size)
    w6 = _xavier_uniform(keys[5], hidden_size, 1)
    b1 = jnp.zeros((1, hidden_size), jnp.float32)
    b2 = jnp.zeros((1, hidden_size), jnp.float32)
    b3 = jnp.zeros((1, 1), jnp.float32)
    b4 = jnp.zeros((1, hidden_size), jnp.float32)
    b5 = jnp.zeros((1, hidden_size), jnp.float32)
    b6 = jnp.zeros((1, 1), jnp.float32)
    return (w1, b1, w2, b2, w3, b3, w4, b4, w5, b5, w6, b6)


def _reference_forward(state, action, params):
    # Pure-JAX reference of the PyTorch forward, for a sanity check.
    (w1, b1, w2, b2, w3, b3, w4, b4, w5, b5, w6, b6) = params
    x = jnp.concatenate([state, action], axis=1)
    h = jax.nn.relu(x @ w1 + b1)
    h = jax.nn.relu(h @ w2 + b2)
    q1 = h @ w3 + b3
    g = jax.nn.relu(x @ w4 + b4)
    g = jax.nn.relu(g @ w5 + b5)
    q2 = g @ w6 + b6
    return q1, q2


def _check(batch, num_inputs, num_actions, params, packed, key):
    k_state, k_action = jax.random.split(key)
    state = jax.random.normal(k_state, (batch, num_inputs), dtype=jnp.float32)
    action = jax.random.normal(k_action, (batch, num_actions), dtype=jnp.float32)

    q1, q2 = qnetwork_forward(state, action, packed)
    jax.block_until_ready((q1, q2))

    r1, r2 = _reference_forward(state, action, params)
    assert q1.shape == (batch, 1) and q2.shape == (batch, 1)
    assert jnp.allclose(q1, r1, atol=1e-4, rtol=1e-4)
    assert jnp.allclose(q2, r2, atol=1e-4, rtol=1e-4)


if __name__ == "__main__":
    num_inputs, num_actions, hidden_size = 16, 4, 32

    key = jax.random.PRNGKey(0)
    k_params, k_small, k_tiled = jax.random.split(key, 3)

    params = init_qnetwork_params(k_params, num_inputs, num_actions, hidden_size)
    packed = pack_qnetwork_params(params, num_inputs)

    # Small batch: single full-array block, no padding.
    _check(8, num_inputs, num_actions, params, packed, k_small)
    # Larger batch: exercises the tiled (multi-step, megacore-friendly) path.
    _check(512, num_inputs, num_actions, params, packed, k_tiled)

    print("KERNEL_OK")
</pallas_src>

<mosaic_0001>
module attributes {stable_mosaic.version = 11 : i64} {
  func.func @_qnet_kernel(%arg0: i32, %arg1: memref<8x16xf32, #tpu.memory_space<vmem>>, %arg2: memref<8x4xf32, #tpu.memory_space<vmem>>, %arg3: memref<16x64xf32, #tpu.memory_space<vmem>>, %arg4: memref<4x64xf32, #tpu.memory_space<vmem>>, %arg5: memref<1x64xf32, #tpu.memory_space<vmem>>, %arg6: memref<64x64xf32, #tpu.memory_space<vmem>>, %arg7: memref<1x64xf32, #tpu.memory_space<vmem>>, %arg8: memref<8x64xf32, #tpu.memory_space<vmem>>, %arg9: memref<8x1xf32, #tpu.memory_space<vmem>>, %arg10: memref<8x8xf32, #tpu.memory_space<vmem>>) attributes {dimension_semantics = [#tpu.dimension_semantics<parallel>], iteration_bounds = array<i64: 1>, scalar_prefetch = 0 : i64, scratch_operands = 0 : i64, tpu.core_type = #tpu.core_type<tc>, window_params = [{transform_indices = @transform_0, window_bounds = array<i64: 8, 16>}, {transform_indices = @transform_1, window_bounds = array<i64: 8, 4>}, {pipeline_mode = #tpu.pipeline_mode<synchronous>, transform_indices = @transform_2, window_bounds = array<i64: 16, 64>}, {pipeline_mode = #tpu.pipeline_mode<synchronous>, transform_indices = @transform_3, window_bounds = array<i64: 4, 64>}, {pipeline_mode = #tpu.pipeline_mode<synchronous>, transform_indices = @transform_4, window_bounds = array<i64: 1, 64>}, {pipeline_mode = #tpu.pipeline_mode<synchronous>, transform_indices = @transform_5, window_bounds = array<i64: 64, 64>}, {pipeline_mode = #tpu.pipeline_mode<synchronous>, transform_indices = @transform_6, window_bounds = array<i64: 1, 64>}, {pipeline_mode = #tpu.pipeline_mode<synchronous>, transform_indices = @transform_7, window_bounds = array<i64: 8, 64>}, {pipeline_mode = #tpu.pipeline_mode<synchronous>, transform_indices = @transform_8, window_bounds = array<i64: 8, 1>}, {transform_indices = @transform_9, window_bounds = array<i64: 8, 8>}]} {
    %c0 = arith.constant 0 : index
    %c0_0 = arith.constant 0 : index
    %0 = vector.load %arg1[%c0, %c0_0] : memref<8x16xf32, #tpu.memory_space<vmem>>, vector<8x16xf32>
    %c0_1 = arith.constant 0 : index
    %c0_2 = arith.constant 0 : index
    %1 = vector.load %arg3[%c0_1, %c0_2] : memref<16x64xf32, #tpu.memory_space<vmem>>, vector<16x64xf32>
    %cst = arith.constant dense<0.000000e+00> : vector<8x64xf32>
    %2 = tpu.matmul %0, %1, %cst {dimension_numbers = #tpu.dot_dimension_numbers<[1], [0], [0], [1], [0, 0, 1, 1], [], []>} : vector<8x16xf32>, vector<16x64xf32>, vector<8x64xf32> -> vector<8x64xf32>
    %c0_3 = arith.constant 0 : index
    %c0_4 = arith.constant 0 : index
    %3 = vector.load %arg2[%c0_3, %c0_4] : memref<8x4xf32, #tpu.memory_space<vmem>>, vector<8x4xf32>
    %c0_5 = arith.constant 0 : index
    %c0_6 = arith.constant 0 : index
    %4 = vector.load %arg4[%c0_5, %c0_6] : memref<4x64xf32, #tpu.memory_space<vmem>>, vector<4x64xf32>
    %cst_7 = arith.constant dense<0.000000e+00> : vector<8x64xf32>
    %5 = tpu.matmul %3, %4, %cst_7 {dimension_numbers = #tpu.dot_dimension_numbers<[1], [0], [0], [1], [0, 0, 1, 1], [], []>} : vector<8x4xf32>, vector<4x64xf32>, vector<8x64xf32> -> vector<8x64xf32>
    %6 = arith.addf %2, %5 : vector<8x64xf32>
    %c0_8 = arith.constant 0 : index
    %c0_9 = arith.constant 0 : index
    %7 = vector.load %arg5[%c0_8, %c0_9] : memref<1x64xf32, #tpu.memory_space<vmem>>, vector<1x64xf32>
    %8 = vector.broadcast %7 : vector<1x64xf32> to vector<8x64xf32>
    %9 = arith.addf %6, %8 : vector<8x64xf32>
    %cst_10 = arith.constant 0.000000e+00 : f32
    %10 = vector.broadcast %cst_10 : f32 to vector<8x64xf32>
    %11 = arith.maximumf %9, %10 : vector<8x64xf32>
    %c0_11 = arith.constant 0 : index
    %c0_12 = arith.constant 0 : index
    %12 = vector.load %arg6[%c0_11, %c0_12] : memref<64x64xf32, #tpu.memory_space<vmem>>, vector<64x64xf32>
    %cst_13 = arith.constant dense<0.000000e+00> : vector<8x64xf32>
    %13 = tpu.matmul %11, %12, %cst_13 {dimension_numbers = #tpu.dot_dimension_numbers<[1], [0], [0], [1], [0, 0, 1, 1], [], []>} : vector<8x64xf32>, vector<64x64xf32>, vector<8x64xf32> -> vector<8x64xf32>
    %c0_14 = arith.constant 0 : index
    %c0_15 = arith.constant 0 : index
    %14 = vector.load %arg7[%c0_14, %c0_15] : memref<1x64xf32, #tpu.memory_space<vmem>>, vector<1x64xf32>
    %15 = vector.broadcast %14 : vector<1x64xf32> to vector<8x64xf32>
    %16 = arith.addf %13, %15 : vector<8x64xf32>
    %cst_16 = arith.constant 0.000000e+00 : f32
    %17 = vector.broadcast %cst_16 : f32 to vector<8x64xf32>
    %18 = arith.maximumf %16, %17 : vector<8x64xf32>
    %c0_17 = arith.constant 0 : index
    %c0_18 = arith.constant 0 : index
    %19 = vector.load %arg8[%c0_17, %c0_18] : memref<8x64xf32, #tpu.memory_space<vmem>>, vector<8x64xf32>
    %cst_19 = arith.constant dense<0.000000e+00> : vector<8x8xf32>
    %20 = tpu.matmul %19, %18, %cst_19 {dimension_numbers = #tpu.dot_dimension_numbers<[1], [1], [0], [0], [0, 0, 1, 0], [], []>} : vector<8x64xf32>, vector<8x64xf32>, vector<8x8xf32> -> vector<8x8xf32>
    %c0_20 = arith.constant 0 : index
    %c0_21 = arith.constant 0 : index
    %21 = vector.load %arg9[%c0_20, %c0_21] : memref<8x1xf32, #tpu.memory_space<vmem>>, vector<8x1xf32>
    %22 = vector.broadcast %21 : vector<8x1xf32> to vector<8x8xf32>
    %23 = arith.addf %20, %22 : vector<8x8xf32>
    %c0_22 = arith.constant 0 : index
    %c0_23 = arith.constant 0 : index
    %24 = vector.load %arg10[%c0_22, %c0_23] : memref<8x8xf32, #tpu.memory_space<vmem>>, vector<8x8xf32>
    tpu.vector_store %arg10[%c0_22, %c0_23], %23 {strides = array<i32>} : memref<8x8xf32, #tpu.memory_space<vmem>>, vector<8x8xf32>,
    return
  }
  func.func @transform_0(%arg0: i32) -> (i32, i32) {
    %c0_i32 = arith.constant 0 : i32
    %c0_i32_0 = arith.constant 0 : i32
    return %arg0, %c0_i32 : i32, i32
  }
  func.func @transform_1(%arg0: i32) -> (i32, i32) {
    %c0_i32 = arith.constant 0 : i32
    %c0_i32_0 = arith.constant 0 : i32
    return %arg0, %c0_i32 : i32, i32
  }
  func.func @transform_2(%arg0: i32) -> (i32, i32) {
    %c0_i32 = arith.constant 0 : i32
    %c0_i32_0 = arith.constant 0 : i32
    %c0_i32_1 = arith.constant 0 : i32
    return %c0_i32, %c0_i32_0 : i32, i32
  }
  func.func @transform_3(%arg0: i32) -> (i32, i32) {
    %c0_i32 = arith.constant 0 : i32
    %c0_i32_0 = arith.constant 0 : i32
    %c0_i32_1 = arith.constant 0 : i32
    return %c0_i32, %c0_i32_0 : i32, i32
  }
  func.func @transform_4(%arg0: i32) -> (i32, i32) {
    %c0_i32 = arith.constant 0 : i32
    %c0_i32_0 = arith.constant 0 : i32
    %c0_i32_1 = arith.constant 0 : i32
    return %c0_i32, %c0_i32_0 : i32, i32
  }
  func.func @transform_5(%arg0: i32) -> (i32, i32) {
    %c0_i32 = arith.constant 0 : i32
    %c0_i32_0 = arith.constant 0 : i32
    %c0_i32_1 = arith.constant 0 : i32
    return %c0_i32, %c0_i32_0 : i32, i32
  }
  func.func @transform_6(%arg0: i32) -> (i32, i32) {
    %c0_i32 = arith.constant 0 : i32
    %c0_i32_0 = arith.constant 0 : i32
    %c0_i32_1 = arith.constant 0 : i32
    return %c0_i32, %c0_i32_0 : i32, i32
  }
  func.func @transform_7(%arg0: i32) -> (i32, i32) {
    %c0_i32 = arith.constant 0 : i32
    %c0_i32_0 = arith.constant 0 : i32
    %c0_i32_1 = arith.constant 0 : i32
    return %c0_i32, %c0_i32_0 : i32, i32
  }
  func.func @transform_8(%arg0: i32) -> (i32, i32) {
    %c0_i32 = arith.constant 0 : i32
    %c0_i32_0 = arith.constant 0 : i32
    %c0_i32_1 = arith.constant 0 : i32
    return %c0_i32, %c0_i32_0 : i32, i32
  }
  func.func @transform_9(%arg0: i32) -> (i32, i32) {
    %c0_i32 = arith.constant 0 : i32
    %c0_i32_0 = arith.constant 0 : i32
    return %c0_i32, %arg0 : i32, i32
  }
}

</mosaic_0001>

<bundles_post_ra>
// kernel: qnetwork_forward.1
= control target key start
LH: loop header
LB: loop body
LE: loop exit
PB: predicated region body
PF: predicated region fallthrough
CT: control target
= control target key end

     0   :  { %14 = vsyncpa [#allocation3], 0  ;;  %s657_s0 = inlined_call_operand.vmem [shape: f32[8,16], index: 0, kind: input, shape index: {}]   ;;  %s658_s1 = inlined_call_operand.vmem [shape: f32[8,4], index: 1, kind: input, shape index: {}]   ;;  %s659_s2 = inlined_call_operand.vmem [shape: f32[16,64], index: 2, kind: input, shape index: {}]   ;;  %s660_s3 = inlined_call_operand.hbm [shape: f32[4,64], index: 3, kind: input, shape index: {}]   ;;  %s661_s4 = inlined_call_operand.vmem [shape: f32[1,64], index: 4, kind: input, shape index: {}]   ;;  %s662_s5 = inlined_call_operand.hbm [shape: f32[64,64], index: 5, kind: input, shape index: {}]   ;;  %s663_s6 = inlined_call_operand.vmem [shape: f32[1,64], index: 6, kind: input, shape index: {}]   ;;  %s664_s7 = inlined_call_operand.vmem [shape: f32[8,64], index: 7, kind: input, shape index: {}]   ;;  %s665_s8 = inlined_call_operand.vmem [shape: f32[8,1], index: 8, kind: input, shape index: {}]   ;;  %s666_s9 = inlined_call_operand.vmem [shape: f32[8,8], index: 9, kind: output, shape index: {}]  }
   0x1   :  { %15 = vsyncpa [#allocation5], 0  ;;  %s537_s30 = smov [#allocation2]   ;;  %s538_s11 = smov [#allocation4]  }
   0x2   :  { %s28_s10 = sshll.u32 %s537_s30, 4  ;;  %s39_s12 = sshll.u32 %s538_s11, 4  ;;  %s29_s10 = int_to_ptr.vmem [resolvable:$true] %s28_s10  ;;  %s595_s12 = int_to_ptr.vmem [resolvable:$true] %s39_s12 }
   0x3   :  { %s489_s15 = scalar_lea.hbm %s660_s3, 64 }
   0x4   :  { %p490_p0 = scmp.ne.s32.totalorder %s660_s3, %s489_s15  ;;  %p493_p1 = scmp.lt.u32.totalorder %s489_s15, %s660_s3 }
   0x6   :  { %p495_p2 = pnand %p493_p1, %p490_p0 }
   0x8   :  { %498 = shalt.err (!%p495_p2)
}
   0x9   :  { %s499_s20 = scalar_lea.vmem %s29_s10, 64  ;;  %p504_p4 = scmp.lt.s32.totalorder %s29_s10, %s29_s10 }
   0xa   :  { %p500_p3 = scmp.ne.s32.totalorder %s29_s10, %s499_s20  ;;  %p505_p5 = scmp.lt.s32.totalorder %s499_s20, %s499_s20 }
   0xc   :  { %p506_p6 = por %p505_p5, %p504_p4 }
   0xe   :  { %p507_p7 = pnand %p506_p6, %p500_p3 }
  0x10   :  { %510 = shalt.err (!%p507_p7)
}
  0x11   :  { %31 = dma.hbm_to_vmem [thread:$0]  %s660_s3, 64, %s29_s10, [#allocation3]  }
  0x12   :  { %s511_s25 = scalar_lea.hbm %s662_s5, 1024 }
  0x13   :  { %p512_p8 = scmp.ne.s32.totalorder %s662_s5, %s511_s25  ;;  %p515_p9 = scmp.lt.u32.totalorder %s511_s25, %s662_s5 }
  0x15   :  { %p517_p10 = pnand %p515_p9, %p512_p8 }
  0x17   :  { %520 = shalt.err (!%p517_p10)
}
  0x18   :  { %s521_s30 = scalar_lea.vmem %s595_s12, 1024  ;;  %p526_p12 = scmp.lt.s32.totalorder %s595_s12, %s595_s12 }
  0x19   :  { %p522_p11 = scmp.ne.s32.totalorder %s595_s12, %s521_s30  ;;  %p527_p13 = scmp.lt.s32.totalorder %s521_s30, %s521_s30 }
  0x1b   :  { %p528_p0 = por %p527_p13, %p526_p12 }
  0x1d   :  { %p529_p1 = pnand %p528_p0, %p522_p11 }
  0x1f   :  { %532 = shalt.err (!%p529_p1)
}
  0x20   :  { %s539_s3 = smov 128   ;;  %s540_s10 = smov 8  }
  0x21   :  { %45 = dma.hbm_to_vmem [thread:$0]  %s662_s5, 1024, %s595_s12, [#allocation5], %s539_s3, %s539_s3, %s540_s10  }
  0x22   :  { %533 = dma.done.wait [#allocation3], 64  }
  0x23   :  { %534 = vsyncadd [#allocation3], 4294967232 }
  0x24   :  { %535 = dma.done.wait [#allocation5], 1024  }
  0x25   :  { %536 = vsyncadd [#allocation5], 4294966272  ;;  %v541_v0 = vmov 0.0   ;;  %vm542_vm0 = vmmov 0   ;;  %v543_v1 = vmov 0.0|0.0   ;;  %vm67_vm1 = vcmask 1043456  }
  0x26   :  { %429 = vmatprep.subr.mxu1 %v541_v0  ;;  %431 = vmatprep.mubr.msk.f32.mxu1 %vm542_vm0, %v541_v0  ;;  %vm63_vm2 = vcmask 31744   ;;  %v62_v2 = vld [vmem:[#allocation2] sm:$0xf]  ;;  %v60_v5 = vld [vmem:[%s659_s2 + $0x8] sm:$0xff]  ;;  %vm141_vm3 = vcmask 130048   ;;  %v226_v11 = vld [vmem:[#allocation4 + $0x10] sm:$0xff] }
  0x27   :  { %468 = vmatprep.subr.bf16.mxu0 %v543_v1  ;;  %457 = vmatprep.mubr.msk.f32.mxu0 %vm542_vm0, %v541_v0  ;;  %v61_v3 = vld [vmem:[%s658_s1] sm:$0xff]  ;;  %v225_v8 = vld [vmem:[#allocation4 + $0x8] sm:$0xff]  ;;  %v230_v17 = vld [vmem:[#allocation4 + $0x30] sm:$0xff]  ;;  %vm239_vm4 = vcmask 523264   ;;  %v544_v29 = vmov 0   ;;  %vm397_vm5 = vcmask 64512  }
  0x28   :  { %v59_v4 = vld [vmem:[%s659_s2] sm:$0xff]  ;;  %430 = vmatpush3.msk.msra.mxu1 %vm67_vm1, %v62_v2  ;;  %v229_v15 = vld [vmem:[#allocation4 + $0x28] sm:$0xff]  ;;  %488 = vset.pattern.permute.xlu0 %v544_v29 }
  0x29   :  { %v224_v6 = vld [vmem:[#allocation4] sm:$0xff]  ;;  %432 = vmatmul.mubr.msk.f32.vlgmr.msra.gmra.mrb[0].mxu1 %vm63_vm2, %v61_v3  ;;  %465 = vmatprep.subr.bf16.mxu1 %v543_v1  ;;  %v466_v7 = vpack.c.bf16 %v60_v5, %v59_v4  ;;  %v227_v12 = vld [vmem:[#allocation4 + $0x18] sm:$0xff] }
  0x2a   :  { %438 = vmatprep.mubr.msk.f32.mxu1 %vm542_vm0, %v541_v0  ;;  %v469_v9 = vpack.c.bf16 %v225_v8, %v224_v6  ;;  %v58_v10 = vld [vmem:[%s657_s0] sm:$0xff]  ;;  %v472_v13 = vpack.c.bf16 %v227_v12, %v226_v11 }
  0x2b   :  { %467 = vmatpush3.bf16.msra.mxu1 %v466_v7  ;;  %v228_v14 = vld [vmem:[#allocation4 + $0x20] sm:$0xff]  ;;  %v231_v18 = vld [vmem:[#allocation4 + $0x38] sm:$0xff] }
  0x2c   :  { %470 = vmatpush3.bf16.msra.mxu0 %v469_v9  ;;  %460 = vmatprep.subr.mxu1 %v541_v0  ;;  %v475_v16 = vpack.c.bf16 %v229_v15, %v228_v14  ;;  %v478_v19 = vpack.c.bf16 %v231_v18, %v230_v17  ;;  %v408_v23 = vld [vmem:[%s661_s4] ss:$0 sm:$0xff] }
  0x2d   :  { %471 = vmatprep.subr.bf16.mxu0 %v543_v1  ;;  %v315_v28 = vld [vmem:[%s665_s8] sm:$0xff] }
  0x2e   :  { %439 = vmatmul.mubr.msk.f32.vlgmr.msra.gmra.mrb[2].mxu1 %vm141_vm3, %v58_v10  ;;  %318 = vperm.xlu0 %488, %v315_v28   ;;  %v409_v30 = vld [vmem:[%s663_s6] ss:$0 sm:$0xff] }
  0x2f   :  { %462 = vmatprep.mubr.msk.f32.mxu1 %vm542_vm0, %v541_v0  ;;  %v314_v35 = vld [vmem:[%s664_s7] sm:$0xff] }
  0x30   :  { %473 = vmatpush3.bf16.msra.mxu0 %v472_v13 }
  0x31   :  { %474 = vmatprep.subr.bf16.mxu0 %v543_v1 }
  0x34   :  { %476 = vmatpush3.bf16.msra.mxu0 %v475_v16 }
  0x35   :  { %477 = vmatprep.subr.bf16.mxu0 %v543_v1 }
  0x38   :  { %479 = vmatpush3.bf16.msra.mxu0 %v478_v19 }
  0xad   :  { %v319_v36 = vpop.permute.xlu0 %318 }
  0xfc   :  { %v137_v20 = vpop.f32.mrb[0].mxu1 }
  0xfd   :  { %v433_v21 = vpop.f32.mrb[1].mxu1 }
 0x101   :  { %v211_v22 = vpop.f32.mrb[2].mxu1 }
 0x102   :  { %v212_v24 = vadd.f32 %v211_v22, %v137_v20  ;;  %v440_v25 = vpop.f32.mrb[3].mxu1 }
 0x104   :  { %v222_v26 = vadd.f32 %v408_v23, %v212_v24 }
 0x106   :  { %v223_v27 = vmax.f32 %v222_v26, 0.0 }
 0x108   :  { %458 = vmatmul.mubr.msk.f32.vlgmr.msra.gmra.mrb[0].mxu0 %vm239_vm4, %v223_v27 }
 0x1db   :  { %v309_v31 = vpop.f32.mrb[0].mxu0 }
 0x1dc   :  { %v310_v32 = vadd.f32 %v409_v30, %v309_v31  ;;  %v459_v33 = vpop.f32.mrb[1].mxu0 }
 0x1de   :  { %v313_v34 = vmax.f32 %v310_v32, 0.0 }
 0x1e0   :  { %461 = vmatpush3.xpose.msk.msra.mxu1 %vm239_vm4, %v313_v34 }
 0x1e3   :  { %463 = vmatmul.mubr.msk.f32.vlgmr.msra.gmra.mrb[4].mxu1 %vm239_vm4, %v314_v35 }
 0x2b6   :  { %v393_v37 = vpop.f32.mrb[4].mxu1 }
 0x2b7   :  { %v394_v38 = vadd.f32 %v393_v37, %v319_v36  ;;  %v464_v39 = vpop.f32.mrb[5].mxu1 }
 0x2b9   :  { %398 = vst.msk [vmem:[%s666_s9] sm:$0xff] %vm397_vm5, %v394_v38 }
 0x2ba   :  { %403 = vsyncpa [#allocation3], 1 }
 0x2bb   :  { %404 = vsyncpa [#allocation5], 1 }

</bundles_post_ra>
